<compile_context>
chip_gen: v7x
topology: tpu7x:2x2x1
jax: 0.10.0
libtpu: 0.0.40
codegen_flags: <defaults>
</compile_context>

<pallas_src>
import functools

import jax
import jax.numpy as jnp
from jax.experimental import pallas as pl
from jax.experimental.pallas import tpu as pltpu


def _masked_absdiff_sum_kernel(m_ref, r_ref, x_ref, out_ref, acc_ref,
                               *, g_total, g_per_split, num_splits):
    """Grid = (num_splits, g_per_split); axis 1 walks row-blocks of the slab.

    m_ref   : (RT, 1)      float32  per-row 0/1 mask (padded rows are 0)
    r_ref   : (RT, lane_w) input dtype (recons slab block)
    x_ref   : (RT, lane_w) input dtype (x slab block)
    out_ref : (1, 8, 128)  float32  per-split partial sum (broadcast-filled)
    acc_ref : (RT, lane_w) float32  VMEM scratch, elementwise accumulator
    """
    s = pl.program_id(0)
    j = pl.program_id(1)

    @pl.when(j == 0)
    def _init():
        acc_ref[...] = jnp.zeros_like(acc_ref)

    def _accumulate():
        diff = jnp.abs(r_ref[...].astype(jnp.float32)
                       - x_ref[...].astype(jnp.float32))   # (RT, lane_w)
        keep = m_ref[...] != 0.0                            # (RT, 1) bool
        # where (not multiply) so undefined data in partial edge blocks is
        # cleanly dropped even if it is NaN/Inf.
        acc_ref[...] += jnp.where(keep, diff, jnp.float32(0.0))

    if num_splits * g_per_split == g_total:
        _accumulate()                       # exact split: no guard needed
    else:
        pl.when(s * g_per_split + j < g_total)(_accumulate)

    @pl.when(j == g_per_split - 1)
    def _finalize():
        total = jnp.sum(acc_ref[...])       # one reduction per split
        out_ref[...] = jnp.full(out_ref.shape, total, dtype=jnp.float32)


def real_recon_loss(recons, x, y):
    """recons, x: [B, ...feature dims...]; y: [B] integer labels. Scalar f32."""
    assert recons.shape == x.shape
    B = int(x.shape[0])
    D = 1
    for d in x.shape[1:]:
        D *= int(d)

    LANE = 128

    # --- flatten (zero-copy on the hot path); pad only if D % 128 != 0 ---
    if D % LANE == 0:
        d_work = D
        x2 = x.reshape(B, d_work)
        r2 = recons.reshape(B, d_work)
    else:
        d_work = ((D + LANE - 1) // LANE) * LANE
        pad = ((0, 0), (0, d_work - D))
        x2 = jnp.pad(x.reshape(B, D), pad)        # zero pad -> |diff| = 0
        r2 = jnp.pad(recons.reshape(B, D), pad)

    # Widest lane width that divides the per-sample length -> each slab row
    # belongs to exactly one sample (per-row mask is exact).
    lane_w = LANE
    for w in (2048, 1024, 512, 256, 128):
        if d_work % w == 0:
            lane_w = w
            break

    rows_per_sample = d_work // lane_w
    R = B * rows_per_sample
    x_slab = x2.reshape(R, lane_w)                # no dtype change: keep bf16 narrow
    r_slab = r2.reshape(R, lane_w)

    # --- tiling: ~512K elements per block (fits VMEM on v5e/v6e/v7x) ---
    TARGET_BLOCK_ELEMS = 512 * 1024
    rows_budget = max(16, (TARGET_BLOCK_ELEMS // lane_w) // 16 * 16)
    if R <= rows_budget:
        rt = R                                    # block sublane = full dim (legal)
        g_total = 1
    else:
        rt = rows_budget                          # multiple of 16 (>=8) sublanes
        g_total = -(-R // rt)

    num_splits = 2 if g_total >= 2 else 1         # feeds both TCs on v7x
    g_per_split = -(-g_total // num_splits)

    # --- per-row mask, padded so every accessed mask block is in-bounds ---
    samp_mask = (y.astype(jnp.int32) == 1).astype(jnp.float32)      # (B,)
    row_mask = jnp.repeat(samp_mask, rows_per_sample)               # (R,)
    r_pad = g_total * rt
    if r_pad != R:
        row_mask = jnp.pad(row_mask, (0, r_pad - R))                # zeros
    row_mask = row_mask.reshape(r_pad, 1)

    if num_splits * g_per_split == g_total:
        def row_of(s_, j_):
            return s_ * g_per_split + j_
    else:
        def row_of(s_, j_):
            return jnp.minimum(s_ * g_per_split + j_, g_total - 1)

    data_spec = pl.BlockSpec((rt, lane_w), lambda s_, j_: (row_of(s_, j_), 0))
    mask_spec = pl.BlockSpec((rt, 1), lambda s_, j_: (row_of(s_, j_), 0))
    out_spec = pl.BlockSpec((1, 8, LANE), lambda s_, j_: (s_, 0, 0))

    kernel = functools.partial(
        _masked_absdiff_sum_kernel,
        g_total=g_total, g_per_split=g_per_split, num_splits=num_splits)

    partials = pl.pallas_call(
        kernel,
        out_shape=jax.ShapeDtypeStruct((num_splits, 8, LANE), jnp.float32),
        grid_spec=pltpu.PrefetchScalarGridSpec(
            num_scalar_prefetch=0,
            grid=(num_splits, g_per_split),
            in_specs=[mask_spec, data_spec, data_spec],
            out_specs=out_spec,
            scratch_shapes=[pltpu.VMEM((rt, lane_w), jnp.float32)],
        ),
        compiler_params=pltpu.CompilerParams(
            dimension_semantics=("parallel", "arbitrary"),
            vmem_limit_bytes=32 * 1024 * 1024,
        ),
    )(row_mask, r_slab, x_slab)

    total = jnp.sum(partials[:, 0, 0])
    count = jnp.sum(samp_mask)
    denom = count * jnp.float32(D)                # true (unpadded) element count
    return jnp.where(count > 0, total / jnp.maximum(denom, 1.0), jnp.float32(0.0))


def _reference(recons, x, y):
    """Pure-JAX reference matching the PyTorch semantics."""
    B = x.shape[0]
    mask = (y == 1).astype(jnp.float32)                              # (B,)
    diff = jnp.abs(recons.astype(jnp.float32)
                   - x.astype(jnp.float32)).reshape(B, -1)           # (B, D)
    per_sample_sum = jnp.sum(diff, axis=1)
    count = jnp.sum(mask)
    total = jnp.sum(per_sample_sum * mask)
    denom = count * diff.shape[1]
    return jnp.where(count > 0, total / jnp.maximum(denom, 1.0), jnp.float32(0.0))


if __name__ == "__main__":
    key = jax.random.PRNGKey(0)
    k1, k2 = jax.random.split(key)

    B, C, H, W = 2, 4, 16, 16
    x = jax.random.normal(k1, (B, C, H, W), dtype=jnp.float32)
    recons = jax.random.normal(k2, (B, C, H, W), dtype=jnp.float32)
    y = jnp.array([1, 0], dtype=jnp.int32)            # one real, one fake

    loss = jax.block_until_ready(real_recon_loss(recons, x, y))
    ref = jax.block_until_ready(_reference(recons, x, y))
    assert jnp.allclose(loss, ref, rtol=1e-4, atol=1e-5), (loss, ref)

    # No "real" samples -> exactly 0.0.
    y_none = jnp.array([0, 0], dtype=jnp.int32)
    loss0 = jax.block_until_ready(real_recon_loss(recons, x, y_none))
    assert float(loss0) == 0.0, loss0

    # bf16 inputs stay bf16 on the wire (no wrapper upcast).
    xb = x.astype(jnp.bfloat16)
    rb = recons.astype(jnp.bfloat16)
    loss_b = jax.block_until_ready(real_recon_loss(rb, xb, y))
    ref_b = jax.block_until_ready(_reference(rb, xb, y))
    assert jnp.allclose(loss_b, ref_b, rtol=1e-3, atol=1e-4), (loss_b, ref_b)

    # Ragged feature length (D % 128 != 0) exercises the padded fallback.
    k3, k4 = jax.random.split(k2)
    x_r = jax.random.normal(k3, (2, 3, 10, 10), dtype=jnp.float32)
    r_r = jax.random.normal(k4, (2, 3, 10, 10), dtype=jnp.float32)
    y_r = jnp.array([1, 1], dtype=jnp.int32)
    loss_r = jax.block_until_ready(real_recon_loss(r_r, x_r, y_r))
    ref_r = jax.block_until_ready(_reference(r_r, x_r, y_r))
    assert jnp.allclose(loss_r, ref_r, rtol=1e-4, atol=1e-5), (loss_r, ref_r)

    print("KERNEL_OK")
</pallas_src>

<mosaic_0001>
module attributes {stable_mosaic.version = 11 : i64} {
  func.func @_masked_absdiff_sum_kernel(%arg0: i32, %arg1: i32, %arg2: memref<2x1xf32, #tpu.memory_space<vmem>>, %arg3: memref<2x1024xf32, #tpu.memory_space<vmem>>, %arg4: memref<2x1024xf32, #tpu.memory_space<vmem>>, %arg5: memref<1x8x128xf32, #tpu.memory_space<vmem>>, %arg6: memref<2x1024xf32, #tpu.memory_space<vmem>>) attributes {dimension_semantics = [#tpu.dimension_semantics<parallel>, #tpu.dimension_semantics<arbitrary>], iteration_bounds = array<i64: 1, 1>, scalar_prefetch = 0 : i64, scratch_operands = 1 : i64, tpu.core_type = #tpu.core_type<tc>, window_params = [{transform_indices = @transform_0, window_bounds = array<i64: 2, 1>}, {transform_indices = @transform_1, window_bounds = array<i64: 2, 1024>}, {transform_indices = @transform_2, window_bounds = array<i64: 2, 1024>}, {transform_indices = @transform_3, window_bounds = array<i64: 1, 8, 128>}]} {
    %c0_i32 = arith.constant 0 : i32
    %0 = arith.cmpi eq, %arg1, %c0_i32 : i32
    %1 = arith.extui %0 : i1 to i32
    %c0_i32_0 = arith.constant 0 : i32
    %2 = arith.cmpi ne, %1, %c0_i32_0 : i32
    scf.if %2 {
      %cst_13 = arith.constant 0.000000e+00 : f32
      %20 = vector.broadcast %cst_13 : f32 to vector<2x1024xf32>
      %c0_14 = arith.constant 0 : index
      %c0_15 = arith.constant 0 : index
      %21 = vector.load %arg6[%c0_14, %c0_15] : memref<2x1024xf32, #tpu.memory_space<vmem>>, vector<2x1024xf32>
      tpu.vector_store %arg6[%c0_14, %c0_15], %20 {strides = array<i32>} : memref<2x1024xf32, #tpu.memory_space<vmem>>, vector<2x1024xf32>,
    } else {
    }
    %c0 = arith.constant 0 : index
    %c0_1 = arith.constant 0 : index
    %3 = vector.load %arg3[%c0, %c0_1] : memref<2x1024xf32, #tpu.memory_space<vmem>>, vector<2x1024xf32>
    %c0_2 = arith.constant 0 : index
    %c0_3 = arith.constant 0 : index
    %4 = vector.load %arg4[%c0_2, %c0_3] : memref<2x1024xf32, #tpu.memory_space<vmem>>, vector<2x1024xf32>
    %5 = arith.subf %3, %4 : vector<2x1024xf32>
    %6 = math.absf %5 : vector<2x1024xf32>
    %c0_4 = arith.constant 0 : index
    %c0_5 = arith.constant 0 : index
    %7 = vector.load %arg2[%c0_4, %c0_5] : memref<2x1xf32, #tpu.memory_space<vmem>>, vector<2x1xf32>
    %cst = arith.constant 0.000000e+00 : f32
    %8 = vector.broadcast %cst : f32 to vector<2x1xf32>
    %9 = arith.cmpf one, %7, %8 : vector<2x1xf32>
    %c0_6 = arith.constant 0 : index
    %c0_7 = arith.constant 0 : index
    %10 = vector.load %arg6[%c0_6, %c0_7] : memref<2x1024xf32, #tpu.memory_space<vmem>>, vector<2x1024xf32>
    %cst_8 = arith.constant 0.000000e+00 : f32
    %11 = vector.shape_cast %9 : vector<2x1xi1> to vector<2x1xi1>
    %12 = vector.broadcast %11 : vector<2x1xi1> to vector<2x1024xi1>
    %13 = vector.broadcast %cst_8 : f32 to vector<2x1024xf32>
    %14 = arith.select %12, %6, %13 : vector<2x1024xi1>, vector<2x1024xf32>
    %15 = arith.addf %10, %14 : vector<2x1024xf32>
    %c0_9 = arith.constant 0 : index
    %c0_10 = arith.constant 0 : index
    %16 = vector.load %arg6[%c0_9, %c0_10] : memref<2x1024xf32, #tpu.memory_space<vmem>>, vector<2x1024xf32>
    tpu.vector_store %arg6[%c0_9, %c0_10], %15 {strides = array<i32>} : memref<2x1024xf32, #tpu.memory_space<vmem>>, vector<2x1024xf32>,
    %c0_i32_11 = arith.constant 0 : i32
    %17 = arith.cmpi eq, %arg1, %c0_i32_11 : i32
    %18 = arith.extui %17 : i1 to i32
    %c0_i32_12 = arith.constant 0 : i32
    %19 = arith.cmpi ne, %18, %c0_i32_12 : i32
    scf.if %19 {
      %c0_13 = arith.constant 0 : index
      %c0_14 = arith.constant 0 : index
      %20 = vector.load %arg6[%c0_13, %c0_14] : memref<2x1024xf32, #tpu.memory_space<vmem>>, vector<2x1024xf32>
      %21 = vector.shape_cast %20 : vector<2x1024xf32> to vector<1x2x1024xf32>
      %cst_15 = arith.constant dense<0.000000e+00> : vector<1xf32>
      %22 = vector.multi_reduction <add>, %21, %cst_15 [1, 2] : vector<1x2x1024xf32> to vector<1xf32>
      %23 = vector.shape_cast %22 : vector<1xf32> to vector<1x1x1xf32>
      %24 = vector.extract %23[0, 0, 0] : f32 from vector<1x1x1xf32>
      %25 = vector.broadcast %24 : f32 to vector<1x8x128xf32>
      %c0_16 = arith.constant 0 : index
      %c0_17 = arith.constant 0 : index
      %c0_18 = arith.constant 0 : index
      %26 = vector.load %arg5[%c0_16, %c0_17, %c0_18] : memref<1x8x128xf32, #tpu.memory_space<vmem>>, vector<1x8x128xf32>
      tpu.vector_store %arg5[%c0_16, %c0_17, %c0_18], %25 {strides = array<i32>} : memref<1x8x128xf32, #tpu.memory_space<vmem>>, vector<1x8x128xf32>,
    } else {
    }
    return
  }
  func.func @transform_0(%arg0: i32, %arg1: i32) -> (i32, i32) {
    %c1_i32 = arith.constant 1 : i32
    %0 = arith.muli %arg0, %c1_i32 : i32
    %1 = arith.addi %0, %arg1 : i32
    %c0_i32 = arith.constant 0 : i32
    %c0_i32_0 = arith.constant 0 : i32
    return %1, %c0_i32 : i32, i32
  }
  func.func @transform_1(%arg0: i32, %arg1: i32) -> (i32, i32) {
    %c1_i32 = arith.constant 1 : i32
    %0 = arith.muli %arg0, %c1_i32 : i32
    %1 = arith.addi %0, %arg1 : i32
    %c0_i32 = arith.constant 0 : i32
    %c0_i32_0 = arith.constant 0 : i32
    return %1, %c0_i32 : i32, i32
  }
  func.func @transform_2(%arg0: i32, %arg1: i32) -> (i32, i32) {
    %c1_i32 = arith.constant 1 : i32
    %0 = arith.muli %arg0, %c1_i32 : i32
    %1 = arith.addi %0, %arg1 : i32
    %c0_i32 = arith.constant 0 : i32
    %c0_i32_0 = arith.constant 0 : i32
    return %1, %c0_i32 : i32, i32
  }
  func.func @transform_3(%arg0: i32, %arg1: i32) -> (i32, i32, i32) {
    %c0_i32 = arith.constant 0 : i32
    %c0_i32_0 = arith.constant 0 : i32
    %c0_i32_1 = arith.constant 0 : i32
    return %arg0, %c0_i32, %c0_i32_0 : i32, i32, i32
  }
}

</mosaic_0001>

<bundles_post_ra>
// kernel: tpu_custom_call.1
= control target key start
LH: loop header
LB: loop body
LE: loop exit
PB: predicated region body
PF: predicated region fallthrough
CT: control target
= control target key end

     0   :  { %8 = vsyncpa [#allocation4], 0  ;;  %s441_s0 = inlined_call_operand.vmem [shape: f32[2,1], index: 0, kind: input, shape index: {}]   ;;  %s442_s1 = inlined_call_operand.hbm [shape: f32[2,1024], index: 1, kind: input, shape index: {}]   ;;  %s443_s2 = inlined_call_operand.hbm [shape: f32[2,1024], index: 2, kind: input, shape index: {}]   ;;  %s444_s3 = inlined_call_operand.hbm [shape: f32[1,8,128], index: 3, kind: output, shape index: {}]  }
   0x1   :  { %9 = vsyncpa [#allocation7], 0 }
   0x2   :  { %10 = vsyncpa [#allocation5], 0  ;;  %s369_s12 = smov [#allocation3]   ;;  %s370_s14 = smov [#allocation6]  }
   0x3   :  { %s29_s13 = sshll.u32 %s369_s12, 4  ;;  %s43_s15 = sshll.u32 %s370_s14, 4  ;;  %s30_s13 = int_to_ptr.vmem [resolvable:$true] %s29_s13  ;;  %s44_s15 = int_to_ptr.vmem [resolvable:$true] %s43_s15 }
   0x4   :  { %s297_s18 = scalar_lea.hbm %s442_s1, 256 }
   0x5   :  { %p298_p0 = scmp.ne.s32.totalorder %s442_s1, %s297_s18  ;;  %p301_p1 = scmp.lt.u32.totalorder %s297_s18, %s442_s1 }
   0x7   :  { %p303_p2 = pnand %p301_p1, %p298_p0 }
   0x9   :  { %306 = shalt.err (!%p303_p2)
}
   0xa   :  { %s307_s23 = scalar_lea.vmem %s30_s13, 256  ;;  %p312_p4 = scmp.lt.s32.totalorder %s30_s13, %s30_s13 }
   0xb   :  { %p308_p3 = scmp.ne.s32.totalorder %s30_s13, %s307_s23  ;;  %p313_p5 = scmp.lt.s32.totalorder %s307_s23, %s307_s23 }
   0xd   :  { %p314_p6 = por %p313_p5, %p312_p4 }
   0xf   :  { %p315_p7 = pnand %p314_p6, %p308_p3 }
  0x11   :  { %318 = shalt.err (!%p315_p7)
}
  0x12   :  { %32 = dma.hbm_to_vmem [thread:$0]  %s442_s1, 256, %s30_s13, [#allocation4]  }
  0x13   :  { %s319_s28 = scalar_lea.hbm %s443_s2, 256 }
  0x14   :  { %p320_p8 = scmp.ne.s32.totalorder %s443_s2, %s319_s28  ;;  %p323_p9 = scmp.lt.u32.totalorder %s319_s28, %s443_s2 }
  0x16   :  { %p325_p10 = pnand %p323_p9, %p320_p8 }
  0x18   :  { %328 = shalt.err (!%p325_p10)
}
  0x19   :  { %s329_s6 = scalar_lea.vmem %s44_s15, 256  ;;  %p334_p12 = scmp.lt.s32.totalorder %s44_s15, %s44_s15 }
  0x1a   :  { %p330_p11 = scmp.ne.s32.totalorder %s44_s15, %s329_s6  ;;  %p335_p13 = scmp.lt.s32.totalorder %s329_s6, %s329_s6 }
  0x1c   :  { %p336_p0 = por %p335_p13, %p334_p12 }
  0x1e   :  { %p337_p1 = pnand %p336_p0, %p330_p11 }
  0x20   :  { %340 = shalt.err (!%p337_p1)
}
  0x21   :  { %46 = dma.hbm_to_vmem [thread:$0]  %s443_s2, 256, %s44_s15, [#allocation7]  }
  0x22   :  { %363 = dma.done.wait [#allocation4], 256  }
  0x23   :  { %364 = vsyncadd [#allocation4], 4294967040 }
  0x24   :  { %365 = dma.done.wait [#allocation7], 256  }
  0x25   :  { %366 = vsyncadd [#allocation7], 4294967040  ;;  %v371_v0 = vmov 0   ;;  %v80_v1 = vld [vmem:[%s441_s0] sm:$0x3]  ;;  %v72_v3 = vld [vmem:[#allocation3] sm:$0xff]  ;;  %v95_v9 = vlaneseq }
  0x26   :  { %296 = vset.pattern.permute.xlu0 %v371_v0  ;;  %vm81_vm0 = vcmp.ne.f32.partialorder %v80_v1, 0.0  ;;  %v74_v4 = vld [vmem:[#allocation6] sm:$0xff]  ;;  %v73_v5 = vld [vmem:[#allocation3 + $0x8] sm:$0xff]  ;;  %v75_v6 = vld [vmem:[#allocation6 + $0x8] sm:$0xff]  ;;  %v372_v7 = vmov 1983009808  }
  0x27   :  { %v84_v2 = vsel %vm81_vm0, 1, %v371_v0  ;;  %v93_v8 = vunpack.c.l.s4 %v372_v7  ;;  %v76_v10 = vsub.f32 %v72_v3, %v74_v4  ;;  %v77_v11 = vsub.f32 %v73_v5, %v75_v6  ;;  %s373_s0 = smov [#allocation8]  }
  0x28   :  { %86 = vperm.xlu0 %296, %v84_v2   ;;  %v96_v13 = vshrl.u32 %v95_v9, 7  ;;  %vm238_vm2 = vcmask 1041408   ;;  %s271_s2 = sshll.u32 %s373_s0, 4  ;;  %s272_s2 = int_to_ptr.vmem [resolvable:$true] %s271_s2 }
  0x29   :  { %v94_v12 = vunpack.c.0.s8 %v93_v8  ;;  %v78_v14 = vand.u32 2147483647, %v76_v10  ;;  %v79_v15 = vand.u32 2147483647, %v77_v11  ;;  %s341_s11 = scalar_lea.vmem %s272_s2, 128  ;;  %p346_p3 = scmp.lt.s32.totalorder %s272_s2, %s272_s2 }
  0x2a   :  { %p342_p2 = scmp.ne.s32.totalorder %s272_s2, %s341_s11  ;;  %p347_p4 = scmp.lt.s32.totalorder %s341_s11, %s341_s11 }
  0x2b   :  { %v97_v16 = vsub.s32 %v94_v12, %v96_v13  ;;  %v91_v17 = vcombine.high %v78_v14, %v78_v14  ;;  %v108_v18 = vcombine.high %v79_v15, %v79_v15 }
  0x2c   :  { %p348_p5 = por %p347_p4, %p346_p3 }
  0x2d   :  { %v98_v19 = vrot.slane %v78_v14, %v97_v16  ;;  %v105_v20 = vrot.slane %v91_v17, %v97_v16  ;;  %v115_v21 = vrot.slane %v79_v15, %v97_v16  ;;  %v122_v22 = vrot.slane %v108_v18, %v97_v16 }
  0x2e   :  { %p349_p6 = pnand %p348_p5, %p342_p2 }
  0x2f   :  { %v106_v23 = vcombine.high %v98_v19, %v98_v19  ;;  %v107_v24 = vcombine.high %v105_v20, %v105_v20  ;;  %v123_v25 = vcombine.high %v115_v21, %v115_v21  ;;  %v124_v27 = vcombine.high %v122_v22, %v122_v22 }
  0xa7   :  { %v87_v26 = vpop.permute.xlu0 %86 }
  0xa8   :  { %vm88_vm1 = vcmp.eq.s32.totalorder %v87_v26, 1 }
  0xa9   :  { %v133_v28 = vsel %vm88_vm1, %v98_v19, 0.0  ;;  %v134_v29 = vsel %vm88_vm1, %v106_v23, 0.0  ;;  %v135_v30 = vsel %vm88_vm1, %v105_v20, 0.0  ;;  %v136_v31 = vsel %vm88_vm1, %v107_v24, 0.0 }
  0xaa   :  { %v137_v32 = vsel %vm88_vm1, %v115_v21, 0.0  ;;  %v138_v33 = vsel %vm88_vm1, %v123_v25, 0.0  ;;  %v149_v34 = vcombine.low %v133_v28, %v134_v29  ;;  %v150_v35 = vcombine.low %v135_v30, %v136_v31 }
  0xab   :  { %v139_v36 = vsel %vm88_vm1, %v122_v22, 0.0  ;;  %v140_v37 = vsel %vm88_vm1, %v124_v27, 0.0  ;;  %v166_v38 = vcombine.low %v137_v32, %v138_v33 }
  0xac   :  { %v157_v39 = vrot.slane %v149_v34, %v97_v16  ;;  %v164_v40 = vrot.slane %v150_v35, %v97_v16  ;;  %v167_v41 = vcombine.low %v139_v36, %v140_v37 }
  0xad   :  { %v174_v42 = vrot.slane %v166_v38, %v97_v16 }
  0xae   :  { %v165_v43 = vcombine.low %v157_v39, %v164_v40  ;;  %v181_v44 = vrot.slane %v167_v41, %v97_v16  ;;  %v287_v45 = vcombine.low %v164_v40, %v164_v40 }
  0xb0   :  { %v182_v46 = vcombine.low %v174_v42, %v181_v44  ;;  %v203_v47 = vrot.slane %v165_v43, %v97_v16  ;;  %v210_v48 = vrot.slane %v287_v45, %v97_v16  ;;  %v288_v50 = vcombine.low %v181_v44, %v181_v44 }
  0xb2   :  { %v211_v49 = vcombine.high %v203_v47, %v203_v47  ;;  %v212_v51 = vcombine.high %v210_v48, %v210_v48  ;;  %v220_v52 = vrot.slane %v182_v46, %v97_v16  ;;  %v239_v53 = vsel %vm238_vm2, %v203_v47, 0.0 }
  0xb3   :  { %v242_v56 = vsel %vm238_vm2, %v210_v48, 0.0  ;;  %v227_v58 = vrot.slane %v288_v50, %v97_v16 }
  0xb4   :  { %v240_v54 = vsel %vm238_vm2, %v211_v49, 0.0  ;;  %v228_v59 = vcombine.high %v220_v52, %v220_v52  ;;  %v244_v60 = vsel %vm238_vm2, %v212_v51, 0.0  ;;  %v246_v62 = vsel %vm238_vm2, %v220_v52, 0.0 }
  0xb5   :  { %v241_v55 = vadd.f32 %v240_v54, %v239_v53  ;;  %v229_v0 = vcombine.high %v227_v58, %v227_v58  ;;  %v250_v3 = vsel %vm238_vm2, %v227_v58, 0.0 }
  0xb6   :  { %v248_v1 = vsel %vm238_vm2, %v228_v59, 0.0 }
  0xb7   :  { %v243_v57 = vadd.f32 %v242_v56, %v241_v55  ;;  %v252_v5 = vsel %vm238_vm2, %v229_v0, 0.0 }
  0xb9   :  { %v245_v61 = vadd.f32 %v244_v60, %v243_v57 }
  0xbb   :  { %v247_v63 = vadd.f32 %v246_v62, %v245_v61 }
  0xbd   :  { %v249_v2 = vadd.f32 %v248_v1, %v247_v63 }
  0xbf   :  { %v251_v4 = vadd.f32 %v250_v3, %v249_v2 }
  0xc1   :  { %v253_v6 = vadd.f32 %v252_v5, %v251_v4 }
  0xc3   :  { %254 = vadd.xlane.f32.xlu0 %v253_v6 }
 0x150   :  { %v255_v7 = vpop.xlane.xlu0 %254 }
 0x151   :  { %v256_v8 = vrot.slane %v255_v7, 4 }
 0x153   :  { %v257_v9 = vadd.f32 %v256_v8, %v255_v7 }
 0x155   :  { %v258_v10 = vrot.slane %v257_v9, 2 }
 0x157   :  { %v259_v11 = vadd.f32 %v258_v10, %v257_v9 }
 0x159   :  { %v260_v12 = vrot.slane %v259_v11, 1 }
 0x15b   :  { %v261_v13 = vadd.f32 %v260_v12, %v259_v11 }
 0x15d   :  { %289 = vpush %v261_v13 }
 0x18e   :  { %s290_s10 = spop %289 }
 0x18f   :  { %v263_v14 = vstv %s290_s10 }
 0x190   :  { %264 = vst [vmem:[#allocation8] sm:$0xff] %v263_v14 }
 0x191   :  { %352 = shalt.err (!%p349_p6)
}
 0x192   :  { %s353_s14 = scalar_lea.hbm %s444_s3, 128 }
 0x193   :  { %p354_p7 = scmp.ne.s32.totalorder %s444_s3, %s353_s14  ;;  %p357_p8 = scmp.lt.u32.totalorder %s353_s14, %s444_s3 }
 0x195   :  { %p359_p9 = pnand %p357_p8, %p354_p7 }
 0x197   :  { %362 = shalt.err (!%p359_p9)
}
 0x198   :  { %274 = dma.vmem_to_hbm [thread:$0]  %s272_s2, 128, %s444_s3, [#allocation5]  }
 0x199   :  { %367 = dma.done.wait [#allocation5], 128  }
 0x19a   :  { %368 = vsyncadd [#allocation5], 4294967168 }
 0x19b   :  { %278 = vsyncpa [#allocation4], 1 }
 0x19c   :  { %279 = vsyncpa [#allocation7], 1 }
 0x19d   :  { %280 = vsyncpa [#allocation5], 1 }

</bundles_post_ra>
